<compile_context>
chip_gen: v7x
topology: tpu7x:2x2x1
jax: 0.10.0
libtpu: 0.0.40
codegen_flags: <defaults>
</compile_context>

<pallas_src>
import functools

import jax
import jax.numpy as jnp
from jax import lax
from jax.experimental import pallas as pl
from jax.experimental.pallas import tpu as pltpu


_VMEM_LIMIT_BYTES = 32 * 1024 * 1024      # explicit scoped-VMEM limit (fits v5e/v6e/v7x)
_TILE_VMEM_BUDGET = 16 * 1024 * 1024      # budget for double-buffered streamed tiles


def _round_up(x, m):
    return ((x + m - 1) // m) * m


def _pick_tile_h(H, Wp, budget_bytes=_TILE_VMEM_BUDGET):
    """Largest multiple-of-8 row-tile height keeping double-buffered tiles in budget."""
    per_row = 2 * 2 * Wp * 4              # (pred + mask) rows, double-buffered, f32
    rows = max(8, budget_bytes // per_row)
    if rows >= H:
        return _round_up(H, 8)
    th = max(8, (rows // 8) * 8)
    # prefer a tile height that divides H exactly (no padded rows / extra copy)
    lo = max(8, ((th // 2) // 8) * 8)
    for cand in range(th, lo - 1, -8):
        if H % cand == 0:
            return cand
    return th


def _make_eps_kernel(H, W, TH):
    """Pass 1: global max of squared neighbour differences of img_gt."""

    def kernel(gt_ref, epsx_ref, epsy_ref, carry_ref):
        i = pl.program_id(0)              # row-tile index (slow axis)
        c = pl.program_id(1)              # channel index (fast axis)

        @pl.when((i == 0) & (c == 0))
        def _init():
            epsx_ref[...] = jnp.zeros_like(epsx_ref)
            epsy_ref[...] = jnp.zeros_like(epsy_ref)

        g = gt_ref[...]                                   # (TH, Wp) one channel's rows
        th, wp = g.shape

        hloc = lax.broadcasted_iota(jnp.int32, (th, wp), 0)
        wloc = lax.broadcasted_iota(jnp.int32, (th, wp), 1)
        grow = hloc + i * TH                              # global row index

        # x direction: (gt[h] - gt[h+1])^2 via sublane roll (XLU, full tile)
        g_dn = pltpu.roll(g, shift=th - 1, axis=0)        # g_dn[h] == g[h+1]
        dx = jnp.square(g - g_dn)
        vx = (hloc < th - 1) & (grow < H - 1)
        epsx_ref[...] = jnp.maximum(epsx_ref[...],
                                    jnp.max(jnp.where(vx, dx, 0.0)))

        # y direction: (gt[:, w] - gt[:, w+1])^2 via lane roll (XLU, full tile)
        g_rt = pltpu.roll(g, shift=wp - 1, axis=1)        # g_rt[:, w] == g[:, w+1]
        dy = jnp.square(g - g_rt)
        vy = (wloc < W - 1) & (grow < H)
        epsy_ref[...] = jnp.maximum(epsy_ref[...],
                                    jnp.max(jnp.where(vy, dy, 0.0)))

        # exact cross-tile boundary: previous tile's last row vs this tile's first row
        @pl.when(i > 0)
        def _boundary():
            prev = carry_ref[pl.ds(c, 1), :]              # (1, Wp), global row i*TH - 1
            bdx = jnp.square(prev - g[0:1, :])
            epsx_ref[...] = jnp.maximum(epsx_ref[...], jnp.max(bdx))

        # carry this tile's last row for the next row-tile of this channel
        carry_ref[pl.ds(c, 1), :] = g[th - 1:th, :]

    return kernel


def _make_loss_kernel(H, W, TH):
    """Pass 2: masked means of relu(sq-neighbour-diff(pred) - eps) -> scalar loss."""

    def kernel(epsx_ref, epsy_ref, pred_ref, mask_ref, out_ref,
               pcarry_ref, mcarry_ref, sx_ref, sy_ref, cx_ref, cy_ref):
        i = pl.program_id(0)
        c = pl.program_id(1)
        n_t = pl.num_programs(0)
        n_c = pl.num_programs(1)

        @pl.when((i == 0) & (c == 0))
        def _init():
            sx_ref[...] = jnp.zeros_like(sx_ref)
            sy_ref[...] = jnp.zeros_like(sy_ref)
            cx_ref[...] = jnp.zeros_like(cx_ref)
            cy_ref[...] = jnp.zeros_like(cy_ref)

        p = pred_ref[...]                                 # (TH, Wp) one channel's rows
        m = mask_ref[...]                                 # (TH, Wp) f32 {0,1} (shared)
        eps_x = epsx_ref[0, 0]                            # SMEM scalars from pass 1
        eps_y = epsy_ref[0, 0]
        th, wp = p.shape

        hloc = lax.broadcasted_iota(jnp.int32, (th, wp), 0)
        wloc = lax.broadcasted_iota(jnp.int32, (th, wp), 1)
        grow = hloc + i * TH

        # ---- x direction, within tile ----
        p_dn = pltpu.roll(p, shift=th - 1, axis=0)
        dx = jnp.maximum(jnp.square(p - p_dn) - eps_x, 0.0)
        vx = (hloc < th - 1) & (grow < H - 1)
        sx_ref[...] += jnp.sum(jnp.where(vx, dx * m, 0.0))
        cx_ref[...] += jnp.sum(jnp.where(vx, m, 0.0))

        # ---- x direction, exact cross-tile boundary row (per channel) ----
        @pl.when(i > 0)
        def _boundary():
            prev_p = pcarry_ref[pl.ds(c, 1), :]           # (1, Wp) pred row i*TH - 1
            prev_m = mcarry_ref[pl.ds(c, 1), :]           # (1, Wp) mask row i*TH - 1
            bdx = jnp.maximum(jnp.square(prev_p - p[0:1, :]) - eps_x, 0.0)
            sx_ref[...] += jnp.sum(bdx * prev_m)
            cx_ref[...] += jnp.sum(prev_m)

        # ---- y direction, fully within tile ----
        p_rt = pltpu.roll(p, shift=wp - 1, axis=1)
        dy = jnp.maximum(jnp.square(p - p_rt) - eps_y, 0.0)
        vy = (wloc < W - 1) & (grow < H)
        sy_ref[...] += jnp.sum(jnp.where(vy, dy * m, 0.0))
        cy_ref[...] += jnp.sum(jnp.where(vy, m, 0.0))

        # update carries for the next row-tile of this channel
        pcarry_ref[pl.ds(c, 1), :] = p[th - 1:th, :]
        mcarry_ref[pl.ds(c, 1), :] = m[th - 1:th, :]

        @pl.when((i == n_t - 1) & (c == n_c - 1))
        def _finalize():
            # counts already carry the xC factor (each channel pass re-adds the mask sum)
            out_ref[...] = 0.5 * (sx_ref[...] / cx_ref[...] + sy_ref[...] / cy_ref[...])

    return kernel


@functools.partial(jax.jit, static_argnames=("tile_h",))
def tv_image_loss(img_pred, img_gt, mask, *, tile_h=None):
    """img_pred, img_gt: (H, W, C) float; mask: (H, W) bool. Returns scalar float32."""
    H, W, C = img_pred.shape

    # channel-major, lane-dense layout: (H, W, C) -> (C, H, W); W sits on the 128-lane axis
    pred = jnp.transpose(img_pred.astype(jnp.float32), (2, 0, 1))
    gt = jnp.transpose(img_gt.astype(jnp.float32), (2, 0, 1))
    mask_f = mask.astype(jnp.float32)

    # pad W to a lane multiple and H to a tile multiple; kernels mask with the true H/W
    Wp = _round_up(W, 128)
    if tile_h is None:
        TH = _pick_tile_h(H, Wp)
    else:
        TH = max(8, (min(int(tile_h), H) // 8) * 8)
    if TH >= H:
        TH = _round_up(H, 8)
    nT = pl.cdiv(H, TH)
    Hp = nT * TH
    if Hp != H or Wp != W:
        pred = jnp.pad(pred, ((0, 0), (0, Hp - H), (0, Wp - W)))
        gt = jnp.pad(gt, ((0, 0), (0, Hp - H), (0, Wp - W)))
        mask_f = jnp.pad(mask_f, ((0, Hp - H), (0, Wp - W)))

    pred2 = pred.reshape(C * Hp, Wp)      # channel-major fused rows, lane-dense
    gt2 = gt.reshape(C * Hp, Wp)

    tile_spec = pl.BlockSpec((TH, Wp), lambda i, c: (c * nT + i, 0))
    mask_spec = pl.BlockSpec((TH, Wp), lambda i, c: (i, 0))
    scalar_out_spec = pl.BlockSpec((1, 1), lambda i, c: (0, 0))
    smem_spec = pl.BlockSpec(memory_space=pltpu.MemorySpace.SMEM)
    compiler_params = pltpu.CompilerParams(
        dimension_semantics=("arbitrary", "arbitrary"),
        vmem_limit_bytes=_VMEM_LIMIT_BYTES,
    )

    # ---- pass 1: eps_x / eps_y = global max of gt squared neighbour diffs ----
    eps_x, eps_y = pl.pallas_call(
        _make_eps_kernel(H, W, TH),
        out_shape=(jax.ShapeDtypeStruct((1, 1), jnp.float32),
                   jax.ShapeDtypeStruct((1, 1), jnp.float32)),
        grid_spec=pltpu.PrefetchScalarGridSpec(
            num_scalar_prefetch=0,
            grid=(nT, C),
            in_specs=[tile_spec],
            out_specs=(scalar_out_spec, scalar_out_spec),
            scratch_shapes=[pltpu.VMEM((C, Wp), jnp.float32)],   # gt carry rows
        ),
        compiler_params=compiler_params,
    )(gt2)

    # ---- pass 2: masked means of relu(pred sq-diff - eps), final scalar loss ----
    loss = pl.pallas_call(
        _make_loss_kernel(H, W, TH),
        out_shape=jax.ShapeDtypeStruct((1, 1), jnp.float32),
        grid_spec=pltpu.PrefetchScalarGridSpec(
            num_scalar_prefetch=0,
            grid=(nT, C),
            in_specs=[smem_spec, smem_spec, tile_spec, mask_spec],
            out_specs=scalar_out_spec,
            scratch_shapes=[
                pltpu.VMEM((C, Wp), jnp.float32),   # pred carry rows
                pltpu.VMEM((C, Wp), jnp.float32),   # mask carry rows
                pltpu.VMEM((1, 1), jnp.float32),    # sum_x
                pltpu.VMEM((1, 1), jnp.float32),    # sum_y
                pltpu.VMEM((1, 1), jnp.float32),    # cnt_x (already x C)
                pltpu.VMEM((1, 1), jnp.float32),    # cnt_y (already x C)
            ],
        ),
        compiler_params=compiler_params,
    )(eps_x, eps_y, pred2, mask_f)

    return loss[0, 0]


def _reference(img_pred, img_gt, mask):
    # Pure-JAX reference mirroring the PyTorch forward exactly.
    diff_x_gt = jnp.square(img_gt[:-1, :, :] - img_gt[1:, :, :])
    diff_y_gt = jnp.square(img_gt[:, :-1, :] - img_gt[:, 1:, :])
    eps_x = diff_x_gt.max()
    eps_y = diff_y_gt.max()
    dx = jnp.maximum(jnp.square(img_pred[:-1, :, :] - img_pred[1:, :, :]) - eps_x, 0.0)
    dy = jnp.maximum(jnp.square(img_pred[:, :-1, :] - img_pred[:, 1:, :]) - eps_y, 0.0)
    mx = mask[:-1, :].astype(jnp.float32)[:, :, None]
    my = mask[:, :-1].astype(jnp.float32)[:, :, None]
    c = img_pred.shape[-1]
    diff_x = jnp.sum(dx * mx) / (jnp.sum(mx) * c)
    diff_y = jnp.sum(dy * my) / (jnp.sum(my) * c)
    return (diff_x + diff_y) / 2.0


if __name__ == "__main__":
    # primary small case (single tile per channel)
    H, W, C = 16, 16, 4
    k1, k2, k3 = jax.random.split(jax.random.PRNGKey(0), 3)
    img_pred = jax.random.normal(k1, (H, W, C), dtype=jnp.float32)
    img_gt = img_pred + 0.05 * jax.random.normal(k2, (H, W, C), dtype=jnp.float32)
    mask = jax.random.bernoulli(k3, p=0.7, shape=(H, W))

    loss = tv_image_loss(img_pred, img_gt, mask)
    jax.block_until_ready(loss)
    ref = _reference(img_pred, img_gt, mask)
    assert jnp.allclose(loss, ref, rtol=1e-5, atol=1e-6), (loss, ref)

    # multi-tile case: exercises the streamed grid, carry rows and H/W padding
    H2, W2, C2 = 40, 24, 3
    kk1, kk2, kk3 = jax.random.split(jax.random.PRNGKey(1), 3)
    p2 = jax.random.normal(kk1, (H2, W2, C2), dtype=jnp.float32)
    g2 = p2 + 0.05 * jax.random.normal(kk2, (H2, W2, C2), dtype=jnp.float32)
    m2 = jax.random.bernoulli(kk3, p=0.6, shape=(H2, W2))

    loss2 = tv_image_loss(p2, g2, m2, tile_h=16)
    jax.block_until_ready(loss2)
    ref2 = _reference(p2, g2, m2)
    assert jnp.allclose(loss2, ref2, rtol=1e-5, atol=1e-6), (loss2, ref2)

    print("KERNEL_OK")
</pallas_src>

<mosaic_0001>
module attributes {stable_mosaic.version = 11 : i64} {
  func.func @kernel(%arg0: i32, %arg1: i32, %arg2: memref<16x128xf32, #tpu.memory_space<vmem>>, %arg3: memref<1x1xf32, #tpu.memory_space<vmem>>, %arg4: memref<1x1xf32, #tpu.memory_space<vmem>>, %arg5: memref<4x128xf32, #tpu.memory_space<vmem>>) attributes {dimension_semantics = [#tpu.dimension_semantics<arbitrary>, #tpu.dimension_semantics<arbitrary>], iteration_bounds = array<i64: 1, 4>, scalar_prefetch = 0 : i64, scratch_operands = 1 : i64, tpu.core_type = #tpu.core_type<tc>, window_params = [{transform_indices = @transform_0, window_bounds = array<i64: 16, 128>}, {pipeline_mode = #tpu.pipeline_mode<synchronous>, transform_indices = @transform_1, window_bounds = array<i64: 1, 1>}, {pipeline_mode = #tpu.pipeline_mode<synchronous>, transform_indices = @transform_2, window_bounds = array<i64: 1, 1>}]} {
    %c0_i32 = arith.constant 0 : i32
    %0 = arith.cmpi eq, %arg0, %c0_i32 : i32
    %c0_i32_0 = arith.constant 0 : i32
    %1 = arith.cmpi eq, %arg1, %c0_i32_0 : i32
    %2 = arith.andi %0, %1 : i1
    %3 = arith.extui %2 : i1 to i32
    %c0_i32_1 = arith.constant 0 : i32
    %4 = arith.cmpi ne, %3, %c0_i32_1 : i32
    scf.if %4 {
      %cst_21 = arith.constant 0.000000e+00 : f32
      %53 = vector.broadcast %cst_21 : f32 to vector<1x1xf32>
      %c0_22 = arith.constant 0 : index
      %c0_23 = arith.constant 0 : index
      %54 = vector.load %arg3[%c0_22, %c0_23] : memref<1x1xf32, #tpu.memory_space<vmem>>, vector<1x1xf32>
      tpu.vector_store %arg3[%c0_22, %c0_23], %53 {strides = array<i32>} : memref<1x1xf32, #tpu.memory_space<vmem>>, vector<1x1xf32>,
      %cst_24 = arith.constant 0.000000e+00 : f32
      %55 = vector.broadcast %cst_24 : f32 to vector<1x1xf32>
      %c0_25 = arith.constant 0 : index
      %c0_26 = arith.constant 0 : index
      %56 = vector.load %arg4[%c0_25, %c0_26] : memref<1x1xf32, #tpu.memory_space<vmem>>, vector<1x1xf32>
      tpu.vector_store %arg4[%c0_25, %c0_26], %55 {strides = array<i32>} : memref<1x1xf32, #tpu.memory_space<vmem>>, vector<1x1xf32>,
    } else {
    }
    %c0 = arith.constant 0 : index
    %c0_2 = arith.constant 0 : index
    %5 = vector.load %arg2[%c0, %c0_2] : memref<16x128xf32, #tpu.memory_space<vmem>>, vector<16x128xf32>
    %6 = tpu.iota {dimensions = array<i32: 0>} : vector<16x128xi32>
    %7 = tpu.iota {dimensions = array<i32: 1>} : vector<16x128xi32>
    %c16_i32 = arith.constant 16 : i32
    %8 = arith.muli %arg0, %c16_i32 : i32
    %9 = vector.broadcast %8 : i32 to vector<16x128xi32>
    %10 = arith.addi %6, %9 : vector<16x128xi32>
    %c15_i32 = arith.constant 15 : i32
    %11 = tpu.dynamic_rotate %5 by %c15_i32 dim 0 : vector<16x128xf32>, i32 -> vector<16x128xf32>
    %12 = arith.subf %5, %11 : vector<16x128xf32>
    %13 = arith.mulf %12, %12 : vector<16x128xf32>
    %c15_i32_3 = arith.constant 15 : i32
    %14 = vector.broadcast %c15_i32_3 : i32 to vector<16x128xi32>
    %15 = arith.cmpi slt, %6, %14 : vector<16x128xi32>
    %c15_i32_4 = arith.constant 15 : i32
    %16 = vector.broadcast %c15_i32_4 : i32 to vector<16x128xi32>
    %17 = arith.cmpi slt, %10, %16 : vector<16x128xi32>
    %18 = arith.andi %15, %17 : vector<16x128xi1>
    %c0_5 = arith.constant 0 : index
    %c0_6 = arith.constant 0 : index
    %19 = vector.load %arg3[%c0_5, %c0_6] : memref<1x1xf32, #tpu.memory_space<vmem>>, vector<1x1xf32>
    %cst = arith.constant 0.000000e+00 : f32
    %20 = vector.broadcast %cst : f32 to vector<16x128xf32>
    %21 = arith.select %18, %13, %20 : vector<16x128xi1>, vector<16x128xf32>
    %22 = vector.shape_cast %21 : vector<16x128xf32> to vector<1x16x128xf32>
    %cst_7 = arith.constant dense<0xFF800000> : vector<1xf32>
    %23 = vector.multi_reduction <maximumf>, %22, %cst_7 [1, 2] : vector<1x16x128xf32> to vector<1xf32>
    %24 = vector.shape_cast %23 : vector<1xf32> to vector<1x1x1xf32>
    %25 = vector.extract %24[0, 0, 0] : f32 from vector<1x1x1xf32>
    %26 = vector.broadcast %25 : f32 to vector<1x1xf32>
    %27 = arith.maximumf %19, %26 : vector<1x1xf32>
    %c0_8 = arith.constant 0 : index
    %c0_9 = arith.constant 0 : index
    %28 = vector.load %arg3[%c0_8, %c0_9] : memref<1x1xf32, #tpu.memory_space<vmem>>, vector<1x1xf32>
    tpu.vector_store %arg3[%c0_8, %c0_9], %27 {strides = array<i32>} : memref<1x1xf32, #tpu.memory_space<vmem>>, vector<1x1xf32>,
    %c127_i32 = arith.constant 127 : i32
    %29 = tpu.dynamic_rotate %5 by %c127_i32 dim 1 : vector<16x128xf32>, i32 -> vector<16x128xf32>
    %30 = arith.subf %5, %29 : vector<16x128xf32>
    %31 = arith.mulf %30, %30 : vector<16x128xf32>
    %c15_i32_10 = arith.constant 15 : i32
    %32 = vector.broadcast %c15_i32_10 : i32 to vector<16x128xi32>
    %33 = arith.cmpi slt, %7, %32 : vector<16x128xi32>
    %c16_i32_11 = arith.constant 16 : i32
    %34 = vector.broadcast %c16_i32_11 : i32 to vector<16x128xi32>
    %35 = arith.cmpi slt, %10, %34 : vector<16x128xi32>
    %36 = arith.andi %33, %35 : vector<16x128xi1>
    %c0_12 = arith.constant 0 : index
    %c0_13 = arith.constant 0 : index
    %37 = vector.load %arg4[%c0_12, %c0_13] : memref<1x1xf32, #tpu.memory_space<vmem>>, vector<1x1xf32>
    %cst_14 = arith.constant 0.000000e+00 : f32
    %38 = vector.broadcast %cst_14 : f32 to vector<16x128xf32>
    %39 = arith.select %36, %31, %38 : vector<16x128xi1>, vector<16x128xf32>
    %40 = vector.shape_cast %39 : vector<16x128xf32> to vector<1x16x128xf32>
    %cst_15 = arith.constant dense<0xFF800000> : vector<1xf32>
    %41 = vector.multi_reduction <maximumf>, %40, %cst_15 [1, 2] : vector<1x16x128xf32> to vector<1xf32>
    %42 = vector.shape_cast %41 : vector<1xf32> to vector<1x1x1xf32>
    %43 = vector.extract %42[0, 0, 0] : f32 from vector<1x1x1xf32>
    %44 = vector.broadcast %43 : f32 to vector<1x1xf32>
    %45 = arith.maximumf %37, %44 : vector<1x1xf32>
    %c0_16 = arith.constant 0 : index
    %c0_17 = arith.constant 0 : index
    %46 = vector.load %arg4[%c0_16, %c0_17] : memref<1x1xf32, #tpu.memory_space<vmem>>, vector<1x1xf32>
    tpu.vector_store %arg4[%c0_16, %c0_17], %45 {strides = array<i32>} : memref<1x1xf32, #tpu.memory_space<vmem>>, vector<1x1xf32>,
    %c0_i32_18 = arith.constant 0 : i32
    %47 = arith.cmpi sgt, %arg0, %c0_i32_18 : i32
    %48 = arith.extui %47 : i1 to i32
    %c0_i32_19 = arith.constant 0 : i32
    %49 = arith.cmpi ne, %48, %c0_i32_19 : i32
    scf.if %49 {
      %53 = arith.index_cast %arg1 : i32 to index
      %c0_21 = arith.constant 0 : index
      %54 = vector.load %arg5[%53, %c0_21] : memref<4x128xf32, #tpu.memory_space<vmem>>, vector<1x128xf32>
      %55 = vector.extract_strided_slice %5 {offsets = [0, 0], sizes = [1, 128], strides = [1, 1]} : vector<16x128xf32> to vector<1x128xf32>
      %56 = arith.subf %54, %55 : vector<1x128xf32>
      %57 = arith.mulf %56, %56 : vector<1x128xf32>
      %c0_22 = arith.constant 0 : index
      %c0_23 = arith.constant 0 : index
      %58 = vector.load %arg3[%c0_22, %c0_23] : memref<1x1xf32, #tpu.memory_space<vmem>>, vector<1x1xf32>
      %59 = vector.shape_cast %57 : vector<1x128xf32> to vector<1x1x128xf32>
      %cst_24 = arith.constant dense<0xFF800000> : vector<1xf32>
      %60 = vector.multi_reduction <maximumf>, %59, %cst_24 [1, 2] : vector<1x1x128xf32> to vector<1xf32>
      %61 = vector.shape_cast %60 : vector<1xf32> to vector<1x1x1xf32>
      %62 = vector.extract %61[0, 0, 0] : f32 from vector<1x1x1xf32>
      %63 = vector.broadcast %62 : f32 to vector<1x1xf32>
      %64 = arith.maximumf %58, %63 : vector<1x1xf32>
      %c0_25 = arith.constant 0 : index
      %c0_26 = arith.constant 0 : index
      %65 = vector.load %arg3[%c0_25, %c0_26] : memref<1x1xf32, #tpu.memory_space<vmem>>, vector<1x1xf32>
      tpu.vector_store %arg3[%c0_25, %c0_26], %64 {strides = array<i32>} : memref<1x1xf32, #tpu.memory_space<vmem>>, vector<1x1xf32>,
    } else {
    }
    %50 = vector.extract_strided_slice %5 {offsets = [15, 0], sizes = [1, 128], strides = [1, 1]} : vector<16x128xf32> to vector<1x128xf32>
    %51 = arith.index_cast %arg1 : i32 to index
    %c0_20 = arith.constant 0 : index
    %52 = vector.load %arg5[%51, %c0_20] : memref<4x128xf32, #tpu.memory_space<vmem>>, vector<1x128xf32>
    tpu.vector_store %arg5[%51, %c0_20], %50 {strides = array<i32>} : memref<4x128xf32, #tpu.memory_space<vmem>>, vector<1x128xf32>,
    return
  }
  func.func @transform_0(%arg0: i32, %arg1: i32) -> (i32, i32) {
    %c1_i32 = arith.constant 1 : i32
    %0 = arith.muli %arg1, %c1_i32 : i32
    %1 = arith.addi %0, %arg0 : i32
    %c0_i32 = arith.constant 0 : i32
    %c0_i32_0 = arith.constant 0 : i32
    return %1, %c0_i32 : i32, i32
  }
  func.func @transform_1(%arg0: i32, %arg1: i32) -> (i32, i32) {
    %c0_i32 = arith.constant 0 : i32
    %c0_i32_0 = arith.constant 0 : i32
    %c0_i32_1 = arith.constant 0 : i32
    return %c0_i32, %c0_i32_0 : i32, i32
  }
  func.func @transform_2(%arg0: i32, %arg1: i32) -> (i32, i32) {
    %c0_i32 = arith.constant 0 : i32
    %c0_i32_0 = arith.constant 0 : i32
    %c0_i32_1 = arith.constant 0 : i32
    return %c0_i32, %c0_i32_0 : i32, i32
  }
}

module attributes {stable_mosaic.version = 11 : i64} {
  func.func @kernel(%arg0: i32, %arg1: i32, %arg2: memref<1x1xf32, #tpu.memory_space<smem>>, %arg3: memref<1x1xf32, #tpu.memory_space<smem>>, %arg4: memref<16x128xf32, #tpu.memory_space<vmem>>, %arg5: memref<16x128xf32, #tpu.memory_space<vmem>>, %arg6: memref<1x1xf32, #tpu.memory_space<vmem>>, %arg7: memref<4x128xf32, #tpu.memory_space<vmem>>, %arg8: memref<4x128xf32, #tpu.memory_space<vmem>>, %arg9: memref<1x1xf32, #tpu.memory_space<vmem>>, %arg10: memref<1x1xf32, #tpu.memory_space<vmem>>, %arg11: memref<1x1xf32, #tpu.memory_space<vmem>>, %arg12: memref<1x1xf32, #tpu.memory_space<vmem>>) attributes {dimension_semantics = [#tpu.dimension_semantics<arbitrary>, #tpu.dimension_semantics<arbitrary>], iteration_bounds = array<i64: 1, 4>, scalar_prefetch = 0 : i64, scratch_operands = 6 : i64, tpu.core_type = #tpu.core_type<tc>, window_params = [{transform_indices = @transform_0, window_bounds = array<i64: 1, 1>}, {transform_indices = @transform_1, window_bounds = array<i64: 1, 1>}, {transform_indices = @transform_2, window_bounds = array<i64: 16, 128>}, {transform_indices = @transform_3, window_bounds = array<i64: 16, 128>}, {pipeline_mode = #tpu.pipeline_mode<synchronous>, transform_indices = @transform_4, window_bounds = array<i64: 1, 1>}]} {
    %c0_i32 = arith.constant 0 : i32
    %0 = arith.cmpi eq, %arg0, %c0_i32 : i32
    %c0_i32_0 = arith.constant 0 : i32
    %1 = arith.cmpi eq, %arg1, %c0_i32_0 : i32
    %2 = arith.andi %0, %1 : i1
    %3 = arith.extui %2 : i1 to i32
    %c0_i32_1 = arith.constant 0 : i32
    %4 = arith.cmpi ne, %3, %c0_i32_1 : i32
    scf.if %4 {
      %cst_44 = arith.constant 0.000000e+00 : f32
      %94 = vector.broadcast %cst_44 : f32 to vector<1x1xf32>
      %c0_45 = arith.constant 0 : index
      %c0_46 = arith.constant 0 : index
      %95 = vector.load %arg9[%c0_45, %c0_46] : memref<1x1xf32, #tpu.memory_space<vmem>>, vector<1x1xf32>
      tpu.vector_store %arg9[%c0_45, %c0_46], %94 {strides = array<i32>} : memref<1x1xf32, #tpu.memory_space<vmem>>, vector<1x1xf32>,
      %cst_47 = arith.constant 0.000000e+00 : f32
      %96 = vector.broadcast %cst_47 : f32 to vector<1x1xf32>
      %c0_48 = arith.constant 0 : index
      %c0_49 = arith.constant 0 : index
      %97 = vector.load %arg10[%c0_48, %c0_49] : memref<1x1xf32, #tpu.memory_space<vmem>>, vector<1x1xf32>
      tpu.vector_store %arg10[%c0_48, %c0_49], %96 {strides = array<i32>} : memref<1x1xf32, #tpu.memory_space<vmem>>, vector<1x1xf32>,
      %cst_50 = arith.constant 0.000000e+00 : f32
      %98 = vector.broadcast %cst_50 : f32 to vector<1x1xf32>
      %c0_51 = arith.constant 0 : index
      %c0_52 = arith.constant 0 : index
      %99 = vector.load %arg11[%c0_51, %c0_52] : memref<1x1xf32, #tpu.memory_space<vmem>>, vector<1x1xf32>
      tpu.vector_store %arg11[%c0_51, %c0_52], %98 {strides = array<i32>} : memref<1x1xf32, #tpu.memory_space<vmem>>, vector<1x1xf32>,
      %cst_53 = arith.constant 0.000000e+00 : f32
      %100 = vector.broadcast %cst_53 : f32 to vector<1x1xf32>
      %c0_54 = arith.constant 0 : index
      %c0_55 = arith.constant 0 : index
      %101 = vector.load %arg12[%c0_54, %c0_55] : memref<1x1xf32, #tpu.memory_space<vmem>>, vector<1x1xf32>
      tpu.vector_store %arg12[%c0_54, %c0_55], %100 {strides = array<i32>} : memref<1x1xf32, #tpu.memory_space<vmem>>, vector<1x1xf32>,
    } else {
    }
    %c0 = arith.constant 0 : index
    %c0_2 = arith.constant 0 : index
    %5 = vector.load %arg4[%c0, %c0_2] : memref<16x128xf32, #tpu.memory_space<vmem>>, vector<16x128xf32>
    %c0_3 = arith.constant 0 : index
    %c0_4 = arith.constant 0 : index
    %6 = vector.load %arg5[%c0_3, %c0_4] : memref<16x128xf32, #tpu.memory_space<vmem>>, vector<16x128xf32>
    %c0_5 = arith.constant 0 : index
    %c0_6 = arith.constant 0 : index
    %7 = memref.load %arg2[%c0_5, %c0_6] : memref<1x1xf32, #tpu.memory_space<smem>>
    %c0_7 = arith.constant 0 : index
    %c0_8 = arith.constant 0 : index
    %8 = memref.load %arg3[%c0_7, %c0_8] : memref<1x1xf32, #tpu.memory_space<smem>>
    %9 = tpu.iota {dimensions = array<i32: 0>} : vector<16x128xi32>
    %10 = tpu.iota {dimensions = array<i32: 1>} : vector<16x128xi32>
    %c16_i32 = arith.constant 16 : i32
    %11 = arith.muli %arg0, %c16_i32 : i32
    %12 = vector.broadcast %11 : i32 to vector<16x128xi32>
    %13 = arith.addi %9, %12 : vector<16x128xi32>
    %c15_i32 = arith.constant 15 : i32
    %14 = tpu.dynamic_rotate %5 by %c15_i32 dim 0 : vector<16x128xf32>, i32 -> vector<16x128xf32>
    %15 = arith.subf %5, %14 : vector<16x128xf32>
    %16 = arith.mulf %15, %15 : vector<16x128xf32>
    %17 = vector.broadcast %7 : f32 to vector<16x128xf32>
    %18 = arith.subf %16, %17 : vector<16x128xf32>
    %cst = arith.constant 0.000000e+00 : f32
    %19 = vector.broadcast %cst : f32 to vector<16x128xf32>
    %20 = arith.maximumf %18, %19 : vector<16x128xf32>
    %c15_i32_9 = arith.constant 15 : i32
    %21 = vector.broadcast %c15_i32_9 : i32 to vector<16x128xi32>
    %22 = arith.cmpi slt, %9, %21 : vector<16x128xi32>
    %c15_i32_10 = arith.constant 15 : i32
    %23 = vector.broadcast %c15_i32_10 : i32 to vector<16x128xi32>
    %24 = arith.cmpi slt, %13, %23 : vector<16x128xi32>
    %25 = arith.andi %22, %24 : vector<16x128xi1>
    %c0_11 = arith.constant 0 : index
    %c0_12 = arith.constant 0 : index
    %26 = vector.load %arg9[%c0_11, %c0_12] : memref<1x1xf32, #tpu.memory_space<vmem>>, vector<1x1xf32>
    %27 = arith.mulf %20, %6 : vector<16x128xf32>
    %cst_13 = arith.constant 0.000000e+00 : f32
    %28 = vector.broadcast %cst_13 : f32 to vector<16x128xf32>
    %29 = arith.select %25, %27, %28 : vector<16x128xi1>, vector<16x128xf32>
    %30 = vector.shape_cast %29 : vector<16x128xf32> to vector<1x16x128xf32>
    %cst_14 = arith.constant dense<0.000000e+00> : vector<1xf32>
    %31 = vector.multi_reduction <add>, %30, %cst_14 [1, 2] : vector<1x16x128xf32> to vector<1xf32>
    %32 = vector.shape_cast %31 : vector<1xf32> to vector<1x1x1xf32>
    %33 = vector.extract %32[0, 0, 0] : f32 from vector<1x1x1xf32>
    %34 = vector.broadcast %33 : f32 to vector<1x1xf32>
    %35 = arith.addf %26, %34 : vector<1x1xf32>
    %c0_15 = arith.constant 0 : index
    %c0_16 = arith.constant 0 : index
    %36 = vector.load %arg9[%c0_15, %c0_16] : memref<1x1xf32, #tpu.memory_space<vmem>>, vector<1x1xf32>
    tpu.vector_store %arg9[%c0_15, %c0_16], %35 {strides = array<i32>} : memref<1x1xf32, #tpu.memory_space<vmem>>, vector<1x1xf32>,
    %c0_17 = arith.constant 0 : index
    %c0_18 = arith.constant 0 : index
    %37 = vector.load %arg11[%c0_17, %c0_18] : memref<1x1xf32, #tpu.memory_space<vmem>>, vector<1x1xf32>
    %cst_19 = arith.constant 0.000000e+00 : f32
    %38 = vector.broadcast %cst_19 : f32 to vector<16x128xf32>
    %39 = arith.select %25, %6, %38 : vector<16x128xi1>, vector<16x128xf32>
    %40 = vector.shape_cast %39 : vector<16x128xf32> to vector<1x16x128xf32>
    %cst_20 = arith.constant dense<0.000000e+00> : vector<1xf32>
    %41 = vector.multi_reduction <add>, %40, %cst_20 [1, 2] : vector<1x16x128xf32> to vector<1xf32>
    %42 = vector.shape_cast %41 : vector<1xf32> to vector<1x1x1xf32>
    %43 = vector.extract %42[0, 0, 0] : f32 from vector<1x1x1xf32>
    %44 = vector.broadcast %43 : f32 to vector<1x1xf32>
    %45 = arith.addf %37, %44 : vector<1x1xf32>
    %c0_21 = arith.constant 0 : index
    %c0_22 = arith.constant 0 : index
    %46 = vector.load %arg11[%c0_21, %c0_22] : memref<1x1xf32, #tpu.memory_space<vmem>>, vector<1x1xf32>
    tpu.vector_store %arg11[%c0_21, %c0_22], %45 {strides = array<i32>} : memref<1x1xf32, #tpu.memory_space<vmem>>, vector<1x1xf32>,
    %c0_i32_23 = arith.constant 0 : i32
    %47 = arith.cmpi sgt, %arg0, %c0_i32_23 : i32
    %48 = arith.extui %47 : i1 to i32
    %c0_i32_24 = arith.constant 0 : i32
    %49 = arith.cmpi ne, %48, %c0_i32_24 : i32
    scf.if %49 {
      %94 = arith.index_cast %arg1 : i32 to index
      %c0_44 = arith.constant 0 : index
      %95 = vector.load %arg7[%94, %c0_44] : memref<4x128xf32, #tpu.memory_space<vmem>>, vector<1x128xf32>
      %96 = arith.index_cast %arg1 : i32 to index
      %c0_45 = arith.constant 0 : index
      %97 = vector.load %arg8[%96, %c0_45] : memref<4x128xf32, #tpu.memory_space<vmem>>, vector<1x128xf32>
      %98 = vector.extract_strided_slice %5 {offsets = [0, 0], sizes = [1, 128], strides = [1, 1]} : vector<16x128xf32> to vector<1x128xf32>
      %99 = arith.subf %95, %98 : vector<1x128xf32>
      %100 = arith.mulf %99, %99 : vector<1x128xf32>
      %101 = vector.broadcast %7 : f32 to vector<1x128xf32>
      %102 = arith.subf %100, %101 : vector<1x128xf32>
      %cst_46 = arith.constant 0.000000e+00 : f32
      %103 = vector.broadcast %cst_46 : f32 to vector<1x128xf32>
      %104 = arith.maximumf %102, %103 : vector<1x128xf32>
      %c0_47 = arith.constant 0 : index
      %c0_48 = arith.constant 0 : index
      %105 = vector.load %arg9[%c0_47, %c0_48] : memref<1x1xf32, #tpu.memory_space<vmem>>, vector<1x1xf32>
      %106 = arith.mulf %104, %97 : vector<1x128xf32>
      %107 = vector.shape_cast %106 : vector<1x128xf32> to vector<1x1x128xf32>
      %cst_49 = arith.constant dense<0.000000e+00> : vector<1xf32>
      %108 = vector.multi_reduction <add>, %107, %cst_49 [1, 2] : vector<1x1x128xf32> to vector<1xf32>
      %109 = vector.shape_cast %108 : vector<1xf32> to vector<1x1x1xf32>
      %110 = vector.extract %109[0, 0, 0] : f32 from vector<1x1x1xf32>
      %111 = vector.broadcast %110 : f32 to vector<1x1xf32>
      %112 = arith.addf %105, %111 : vector<1x1xf32>
      %c0_50 = arith.constant 0 : index
      %c0_51 = arith.constant 0 : index
      %113 = vector.load %arg9[%c0_50, %c0_51] : memref<1x1xf32, #tpu.memory_space<vmem>>, vector<1x1xf32>
      tpu.vector_store %arg9[%c0_50, %c0_51], %112 {strides = array<i32>} : memref<1x1xf32, #tpu.memory_space<vmem>>, vector<1x1xf32>,
      %c0_52 = arith.constant 0 : index
      %c0_53 = arith.constant 0 : index
      %114 = vector.load %arg11[%c0_52, %c0_53] : memref<1x1xf32, #tpu.memory_space<vmem>>, vector<1x1xf32>
      %115 = vector.shape_cast %97 : vector<1x128xf32> to vector<1x1x128xf32>
      %cst_54 = arith.constant dense<0.000000e+00> : vector<1xf32>
      %116 = vector.multi_reduction <add>, %115, %cst_54 [1, 2] : vector<1x1x128xf32> to vector<1xf32>
      %117 = vector.shape_cast %116 : vector<1xf32> to vector<1x1x1xf32>
      %118 = vector.extract %117[0, 0, 0] : f32 from vector<1x1x1xf32>
      %119 = vector.broadcast %118 : f32 to vector<1x1xf32>
      %120 = arith.addf %114, %119 : vector<1x1xf32>
      %c0_55 = arith.constant 0 : index
      %c0_56 = arith.constant 0 : index
      %121 = vector.load %arg11[%c0_55, %c0_56] : memref<1x1xf32, #tpu.memory_space<vmem>>, vector<1x1xf32>
      tpu.vector_store %arg11[%c0_55, %c0_56], %120 {strides = array<i32>} : memref<1x1xf32, #tpu.memory_space<vmem>>, vector<1x1xf32>,
    } else {
    }
    %c127_i32 = arith.constant 127 : i32
    %50 = tpu.dynamic_rotate %5 by %c127_i32 dim 1 : vector<16x128xf32>, i32 -> vector<16x128xf32>
    %51 = arith.subf %5, %50 : vector<16x128xf32>
    %52 = arith.mulf %51, %51 : vector<16x128xf32>
    %53 = vector.broadcast %8 : f32 to vector<16x128xf32>
    %54 = arith.subf %52, %53 : vector<16x128xf32>
    %cst_25 = arith.constant 0.000000e+00 : f32
    %55 = vector.broadcast %cst_25 : f32 to vector<16x128xf32>
    %56 = arith.maximumf %54, %55 : vector<16x128xf32>
    %c15_i32_26 = arith.constant 15 : i32
    %57 = vector.broadcast %c15_i32_26 : i32 to vector<16x128xi32>
    %58 = arith.cmpi slt, %10, %57 : vector<16x128xi32>
    %c16_i32_27 = arith.constant 16 : i32
    %59 = vector.broadcast %c16_i32_27 : i32 to vector<16x128xi32>
    %60 = arith.cmpi slt, %13, %59 : vector<16x128xi32>
    %61 = arith.andi %58, %60 : vector<16x128xi1>
    %c0_28 = arith.constant 0 : index
    %c0_29 = arith.constant 0 : index
    %62 = vector.load %arg10[%c0_28, %c0_29] : memref<1x1xf32, #tpu.memory_space<vmem>>, vector<1x1xf32>
    %63 = arith.mulf %56, %6 : vector<16x128xf32>
    %cst_30 = arith.constant 0.000000e+00 : f32
    %64 = vector.broadcast %cst_30 : f32 to vector<16x128xf32>
    %65 = arith.select %61, %63, %64 : vector<16x128xi1>, vector<16x128xf32>
    %66 = vector.shape_cast %65 : vector<16x128xf32> to vector<1x16x128xf32>
    %cst_31 = arith.constant dense<0.000000e+00> : vector<1xf32>
    %67 = vector.multi_reduction <add>, %66, %cst_31 [1, 2] : vector<1x16x128xf32> to vector<1xf32>
    %68 = vector.shape_cast %67 : vector<1xf32> to vector<1x1x1xf32>
    %69 = vector.extract %68[0, 0, 0] : f32 from vector<1x1x1xf32>
    %70 = vector.broadcast %69 : f32 to vector<1x1xf32>
    %71 = arith.addf %62, %70 : vector<1x1xf32>
    %c0_32 = arith.constant 0 : index
    %c0_33 = arith.constant 0 : index
    %72 = vector.load %arg10[%c0_32, %c0_33] : memref<1x1xf32, #tpu.memory_space<vmem>>, vector<1x1xf32>
    tpu.vector_store %arg10[%c0_32, %c0_33], %71 {strides = array<i32>} : memref<1x1xf32, #tpu.memory_space<vmem>>, vector<1x1xf32>,
    %c0_34 = arith.constant 0 : index
    %c0_35 = arith.constant 0 : index
    %73 = vector.load %arg12[%c0_34, %c0_35] : memref<1x1xf32, #tpu.memory_space<vmem>>, vector<1x1xf32>
    %cst_36 = arith.constant 0.000000e+00 : f32
    %74 = vector.broadcast %cst_36 : f32 to vector<16x128xf32>
    %75 = arith.select %61, %6, %74 : vector<16x128xi1>, vector<16x128xf32>
    %76 = vector.shape_cast %75 : vector<16x128xf32> to vector<1x16x128xf32>
    %cst_37 = arith.constant dense<0.000000e+00> : vector<1xf32>
    %77 = vector.multi_reduction <add>, %76, %cst_37 [1, 2] : vector<1x16x128xf32> to vector<1xf32>
    %78 = vector.shape_cast %77 : vector<1xf32> to vector<1x1x1xf32>
    %79 = vector.extract %78[0, 0, 0] : f32 from vector<1x1x1xf32>
    %80 = vector.broadcast %79 : f32 to vector<1x1xf32>
    %81 = arith.addf %73, %80 : vector<1x1xf32>
    %c0_38 = arith.constant 0 : index
    %c0_39 = arith.constant 0 : index
    %82 = vector.load %arg12[%c0_38, %c0_39] : memref<1x1xf32, #tpu.memory_space<vmem>>, vector<1x1xf32>
    tpu.vector_store %arg12[%c0_38, %c0_39], %81 {strides = array<i32>} : memref<1x1xf32, #tpu.memory_space<vmem>>, vector<1x1xf32>,
    %83 = vector.extract_strided_slice %5 {offsets = [15, 0], sizes = [1, 128], strides = [1, 1]} : vector<16x128xf32> to vector<1x128xf32>
    %84 = arith.index_cast %arg1 : i32 to index
    %c0_40 = arith.constant 0 : index
    %85 = vector.load %arg7[%84, %c0_40] : memref<4x128xf32, #tpu.memory_space<vmem>>, vector<1x128xf32>
    tpu.vector_store %arg7[%84, %c0_40], %83 {strides = array<i32>} : memref<4x128xf32, #tpu.memory_space<vmem>>, vector<1x128xf32>,
    %86 = vector.extract_strided_slice %6 {offsets = [15, 0], sizes = [1, 128], strides = [1, 1]} : vector<16x128xf32> to vector<1x128xf32>
    %87 = arith.index_cast %arg1 : i32 to index
    %c0_41 = arith.constant 0 : index
    %88 = vector.load %arg8[%87, %c0_41] : memref<4x128xf32, #tpu.memory_space<vmem>>, vector<1x128xf32>
    tpu.vector_store %arg8[%87, %c0_41], %86 {strides = array<i32>} : memref<4x128xf32, #tpu.memory_space<vmem>>, vector<1x128xf32>,
    %c0_i32_42 = arith.constant 0 : i32
    %89 = arith.cmpi eq, %arg0, %c0_i32_42 : i32
    %c3_i32 = arith.constant 3 : i32
    %90 = arith.cmpi eq, %arg1, %c3_i32 : i32
    %91 = arith.andi %89, %90 : i1
    %92 = arith.extui %91 : i1 to i32
    %c0_i32_43 = arith.constant 0 : i32
    %93 = arith.cmpi ne, %92, %c0_i32_43 : i32
    scf.if %93 {
      %c0_44 = arith.constant 0 : index
      %c0_45 = arith.constant 0 : index
      %94 = vector.load %arg9[%c0_44, %c0_45] : memref<1x1xf32, #tpu.memory_space<vmem>>, vector<1x1xf32>
      %c0_46 = arith.constant 0 : index
      %c0_47 = arith.constant 0 : index
      %95 = vector.load %arg11[%c0_46, %c0_47] : memref<1x1xf32, #tpu.memory_space<vmem>>, vector<1x1xf32>
      %96 = arith.divf %94, %95 : vector<1x1xf32>
      %c0_48 = arith.constant 0 : index
      %c0_49 = arith.constant 0 : index
      %97 = vector.load %arg10[%c0_48, %c0_49] : memref<1x1xf32, #tpu.memory_space<vmem>>, vector<1x1xf32>
      %c0_50 = arith.constant 0 : index
      %c0_51 = arith.constant 0 : index
      %98 = vector.load %arg12[%c0_50, %c0_51] : memref<1x1xf32, #tpu.memory_space<vmem>>, vector<1x1xf32>
      %99 = arith.divf %97, %98 : vector<1x1xf32>
      %100 = arith.addf %96, %99 : vector<1x1xf32>
      %cst_52 = arith.constant 5.000000e-01 : f32
      %101 = vector.broadcast %cst_52 : f32 to vector<1x1xf32>
      %102 = arith.mulf %101, %100 : vector<1x1xf32>
      %c0_53 = arith.constant 0 : index
      %c0_54 = arith.constant 0 : index
      %103 = vector.load %arg6[%c0_53, %c0_54] : memref<1x1xf32, #tpu.memory_space<vmem>>, vector<1x1xf32>
      tpu.vector_store %arg6[%c0_53, %c0_54], %102 {strides = array<i32>} : memref<1x1xf32, #tpu.memory_space<vmem>>, vector<1x1xf32>,
    } else {
    }
    return
  }
  func.func @transform_0(%arg0: i32, %arg1: i32) -> (i32, i32) {
    %c0_i32 = arith.constant 0 : i32
    %c0_i32_0 = arith.constant 0 : i32
    %c0_i32_1 = arith.constant 0 : i32
    return %c0_i32, %c0_i32_0 : i32, i32
  }
  func.func @transform_1(%arg0: i32, %arg1: i32) -> (i32, i32) {
    %c0_i32 = arith.constant 0 : i32
    %c0_i32_0 = arith.constant 0 : i32
    %c0_i32_1 = arith.constant 0 : i32
    return %c0_i32, %c0_i32_0 : i32, i32
  }
  func.func @transform_2(%arg0: i32, %arg1: i32) -> (i32, i32) {
    %c1_i32 = arith.constant 1 : i32
    %0 = arith.muli %arg1, %c1_i32 : i32
    %1 = arith.addi %0, %arg0 : i32
    %c0_i32 = arith.constant 0 : i32
    %c0_i32_0 = arith.constant 0 : i32
    return %1, %c0_i32 : i32, i32
  }
  func.func @transform_3(%arg0: i32, %arg1: i32) -> (i32, i32) {
    %c0_i32 = arith.constant 0 : i32
    %c0_i32_0 = arith.constant 0 : i32
    return %arg0, %c0_i32 : i32, i32
  }
  func.func @transform_4(%arg0: i32, %arg1: i32) -> (i32, i32) {
    %c0_i32 = arith.constant 0 : i32
    %c0_i32_0 = arith.constant 0 : i32
    %c0_i32_1 = arith.constant 0 : i32
    return %c0_i32, %c0_i32_0 : i32, i32
  }
}

</mosaic_0001>

<bundles_post_ra>
// kernel: tv_image_loss.2
= control target key start
LH: loop header
LB: loop body
LE: loop exit
PB: predicated region body
PF: predicated region fallthrough
CT: control target
= control target key end

     0   :  { %8 = vsyncpa [#allocation4], 0  ;;  %s579_s0 = inlined_call_operand.vmem [shape: f32[64,128], index: 0, kind: input, shape index: {}]   ;;  %s580_s1 = inlined_call_operand.hbm [shape: f32[1,1], index: 1, kind: output, shape index: {0}]   ;;  %s581_s2 = inlined_call_operand.hbm [shape: f32[1,1], index: 2, kind: output, shape index: {1}]  }
   0x1   :  { %9 = vsyncpa [#allocation6], 0  ;;  %s496_s9 = smov 0   ;;  %s498_s10 = smov 0  }
   0x2   :  { %s500_s11 = smov 0  }
   0x3 LB: > { %s335_s12 = sadd.s32 4294967295, %s475_s11   ;;  %s24_s13 = sadd.s32 1, %s471_s10  ;;  %s475_s11 = sphi %s500_s11, %s15_s11   ;;  %s471_s10 = sphi %s498_s10, %s584_s10   ;;  %s467_s9 = sphi %s496_s9, %s583_s9  }
   0x4   : > { %p25_p0 = scmp.ge.s32.totalorder %s24_s13, 4  ;;  %p338_p1 = scmp.ge.s32.totalorder %s475_s11, 1 }
   0x5   : > { %p124_p2 = scmp.lt.s32.totalorder %s475_s11, 5 }
   0x6   : > { %s586_s13 = smov (%p25_p0, %s24_s13), 0 }
   0x7   : > { %p125_p3 = pnand %p338_p1, %p124_p2 }
   0x8   : > { %s339_s14 = sshll.u32 (!%p125_p3), %s467_s9, 1  ;;  %p151_p4 = scmp.eq.s32.totalorder (!%p125_p3), %s467_s9, 0 }
   0x9   : > { %128 = sbr.rel (%p125_p3) target bundleno = 374 (0x176), region = 24  ;;  %p144_p5 = scmp.lt.s32.totalorder (!%p125_p3), %s339_s14, 7 }
  0x10   : > { %s588_s14 = smov (!%p144_p5, %s339_s14), 7  ;;  %155 = sbr.rel (!%p151_p4) target bundleno = 23 (0x17), region = 28 }
  0x11   : > { %s340_s15 = sshll.u32 %s588_s14, 3  ;;  %vm156_vm0 = vcmask (%p151_p4), 0   ;;  %v477_v0 = vmov (%p151_p4), 0.0  }
  0x12   : > { %s147_s18 = scalar_lea.vmem %s579_s0, %s340_s15  ;;  %157 = vst.msk [vmem:[#allocation3] sm:$0x1] (%p151_p4), %vm156_vm0, %v477_v0  ;;  %158 = vst.msk [vmem:[#allocation5] sm:$0x1] (%p151_p4), %vm156_vm0, %v477_v0 }
  0x17 PF: > { %v159_v1 = vld [vmem:[%s147_s18] sm:$0xff]  ;;  %v160_v2 = vld [vmem:[%s147_s18 + $0x8] sm:$0xff]  ;;  %v161_v3 = vlaneseq  ;;  %s478_s19 = smov 127   ;;  %s479_s20 = smov [#allocation3]   ;;  %vm200_vm5 = vcmask 0  }
  0x18   : > { %202 = vrot.lane.b32.xlu0 %v159_v1, %s478_s19  ;;  %v170_v4 = vrot.slane %v159_v1, 1  ;;  %v171_v5 = vrot.slane %v160_v2, 1  ;;  %s263_s21 = sshll.u32 %s479_s20, 4  ;;  %p520_p6 = scmp.eq.s32.totalorder %s335_s12, 3  ;;  %s264_s21 = int_to_ptr.vmem [resolvable:$true] %s263_s21 }
  0x19   : > { %v162_v6 = vshrl.u32 %v161_v3, 7  ;;  %v165_v18 = vand.u32 127, %v161_v3  ;;  %v185_v33 = vld [vmem:[#allocation3] sm:$0x1]  ;;  %s393_s24 = scalar_lea.vmem %s264_s21, 16  ;;  %s399_s25 = scalar_lea.vmem %s264_s21, 32 }
  0x1a   : > { %p394_p7 = scmp.ne.s32.totalorder %s264_s21, %s393_s24  ;;  %p400_p10 = scmp.lt.s32.totalorder %s264_s21, %s264_s21 }
  0x1b   : > { %v163_v7 = vadd.s32 8, %v162_v6  ;;  %vm172_vm1 = vcmp.lt.s32.totalorder %v162_v6, 7  ;;  %vm210_vm4 = vcmp.lt.s32.totalorder %v165_v18, 15  ;;  %p401_p11 = scmp.lt.s32.totalorder %s399_s25, %s393_s24 }
  0x1c   : > { %204 = vrot.lane.b32.xlu0 %v160_v2, %s478_s19  ;;  %v173_v8 = vsel %vm172_vm1, %v170_v4, %v171_v5  ;;  %v174_v9 = vsel %vm172_vm1, %v171_v5, %v170_v4  ;;  %p395_p8 = pnand %p394_p7, %p520_p6 }
  0x1d   : > { %v175_v10 = vsub.f32 %v159_v1, %v173_v8  ;;  %v176_v11 = vsub.f32 %v160_v2, %v174_v9  ;;  %vm180_vm2 = vcmp.lt.s32.totalorder %v163_v7, 15  ;;  %p402_p12 = por %p401_p11, %p400_p10 }
  0x1e   : > { %vm184_vm3 = vmand %vm180_vm2, %vm180_vm2  ;;  %p396_p9 = pneg %p395_p8 }
  0x1f   : > { %v177_v12 = vmul.f32 %v175_v10, %v175_v10  ;;  %v178_v13 = vmul.f32 %v176_v11, %v176_v11 }
  0x20   : > { %p403_p13 = pnand %p402_p12, %p396_p9 }
  0x21   : > { %v187_v14 = vsel %vm184_vm3, %v178_v13, 0.0 }
  0x22   : > { %v188_v15 = vmax.f32 %v177_v12, %v187_v14 }
  0x24   : > { %189 = vmax.xlane.f32.xlu1 %v188_v15 }
  0x8a   : > { %v203_v16 = vpop.permute.xlu0 %202 }
  0x8b   : > { %v206_v17 = vsub.f32 %v159_v1, %v203_v16 }
  0x8d   : > { %v208_v20 = vmul.f32 %v206_v17, %v206_v17 }
  0x8e   : > { %v205_v19 = vpop.permute.xlu0 %204 }
  0x8f   : > { %v207_v21 = vsub.f32 %v160_v2, %v205_v19  ;;  %v216_v23 = vsel %vm210_vm4, %v208_v20, 0.0 }
  0x91   : > { %v209_v22 = vmul.f32 %v207_v21, %v207_v21 }
  0x93   : > { %v217_v24 = vsel %vm210_vm4, %v209_v22, 0.0 }
  0x94   : > { %v218_v25 = vmax.f32 %v216_v23, %v217_v24 }
  0x96   : > { %219 = vmax.xlane.f32.xlu1 %v218_v25 }
  0xb1   : > { %v190_v26 = vpop.xlane.xlu1 %189 }
  0xb2   : > { %v191_v27 = vrot.slane %v190_v26, 4 }
  0xb4   : > { %v192_v28 = vmax.f32 %v190_v26, %v191_v27 }
  0xb6   : > { %v193_v29 = vrot.slane %v192_v28, 2 }
  0xb8   : > { %v194_v30 = vmax.f32 %v192_v28, %v193_v29 }
  0xba   : > { %v195_v31 = vrot.slane %v194_v30, 1 }
  0xbc   : > { %v196_v32 = vmax.f32 %v194_v30, %v195_v31 }
  0xbe   : > { %349 = vpush %v196_v32 }
  0xef   : > { %s350_s22 = spop %349 }
  0xf0   : > { %v198_v34 = vstv %s350_s22 }
  0xf1   : > { %v199_v35 = vmax.f32 %v185_v33, %v198_v34 }
  0xf3   : > { %201 = vst.msk [vmem:[#allocation3] sm:$0x1] %vm200_vm5, %v199_v35 }
  0xf4   : > { %406 = shalt.err (!%p403_p13)
}
  0xf5   : > { %s407_s28 = scalar_lea.hbm %s580_s1, 16 }
  0xf6   : > { %p408_p0 = scmp.ne.s32.totalorder %s580_s1, %s407_s28  ;;  %p413_p3 = scmp.lt.u32.totalorder %s407_s28, %s580_s1 }
  0xf8   : > { %p409_p1 = pnand %p408_p0, %p520_p6 }
  0xfa   : > { %p410_p2 = pneg %p409_p1 }
  0xfc   : > { %p415_p4 = pnand %p413_p3, %p410_p2 }
  0xfe   : > { %418 = shalt.err (!%p415_p4)
}
  0xff   : > { %354 = dma.vmem_to_hbm [thread:$0]  (%p520_p6), %s264_s21, 16, %s580_s1, [#allocation4]   ;;  %v215_v43 = vld [vmem:[#allocation5] sm:$0x1] }
 0x100   : > { %s480_s7 = smov [#allocation5]  }
 0x101   : > { %s274_s8 = sshll.u32 %s480_s7, 4  ;;  %s275_s8 = int_to_ptr.vmem [resolvable:$true] %s274_s8 }
 0x102   : > { %s419_s12 = scalar_lea.vmem %s275_s8, 16  ;;  %s425_s14 = scalar_lea.vmem %s275_s8, 32 }
 0x103   : > { %p420_p5 = scmp.ne.s32.totalorder %s275_s8, %s419_s12  ;;  %p426_p9 = scmp.lt.s32.totalorder %s275_s8, %s275_s8 }
 0x104   : > { %p427_p10 = scmp.lt.s32.totalorder %s425_s14, %s419_s12 }
 0x105   : > { %p421_p7 = pnand %p420_p5, %p520_p6 }
 0x106   : > { %p428_p11 = por %p427_p10, %p426_p9 }
 0x107   : > { %p422_p8 = pneg %p421_p7 }
 0x109   : > { %p429_p12 = pnand %p428_p11, %p422_p8 }
 0x123   : > { %v220_v36 = vpop.xlane.xlu1 %219 }
 0x124   : > { %v221_v37 = vrot.slane %v220_v36, 4 }
 0x126   : > { %v222_v38 = vmax.f32 %v220_v36, %v221_v37 }
 0x128   : > { %v223_v39 = vrot.slane %v222_v38, 2 }
 0x12a   : > { %v224_v40 = vmax.f32 %v222_v38, %v223_v39 }
 0x12c   : > { %v225_v41 = vrot.slane %v224_v40, 1 }
 0x12e   : > { %v226_v42 = vmax.f32 %v224_v40, %v225_v41 }
 0x130   : > { %351 = vpush %v226_v42 }
 0x161   : > { %s352_s9 = spop %351 }
 0x162   : > { %v228_v44 = vstv %s352_s9 }
 0x163   : > { %v229_v45 = vmax.f32 %v215_v43, %v228_v44 }
 0x165   : > { %230 = vst.msk [vmem:[#allocation5] sm:$0x1] %vm200_vm5, %v229_v45 }
 0x166   : > { %432 = shalt.err (!%p429_p12)
}
 0x167   : > { %s433_s17 = scalar_lea.hbm %s581_s2, 16 }
 0x168   : > { %p434_p13 = scmp.ne.s32.totalorder %s581_s2, %s433_s17  ;;  %p439_p2 = scmp.lt.u32.totalorder %s433_s17, %s581_s2 }
 0x16a   : > { %p435_p0 = pnand %p434_p13, %p520_p6 }
 0x16c   : > { %p436_p1 = pneg %p435_p0 }
 0x16e   : > { %p441_p3 = pnand %p439_p2, %p436_p1 }
 0x170   : > { %444 = shalt.err (!%p441_p3)
}
 0x171   : > { %356 = dma.vmem_to_hbm [thread:$0]  (%p520_p6), %s275_s8, 16, %s581_s2, [#allocation6]  }
 0x172   : > { %458 = dma.done.wait (%p520_p6), [#allocation4], 16  }
 0x173   : > { %460 = vsyncadd (%p520_p6), [#allocation4], 4294967280 }
 0x174   : > { %462 = dma.done.wait (%p520_p6), [#allocation6], 16  }
 0x175   : > { %464 = vsyncadd (%p520_p6), [#allocation6], 4294967280 }
 0x176 PF: > { %s15_s11 = sadd.s32 1, %s475_s11   ;;  %s583_s9 = smov %s471_s10 }
 0x177   : > { %p12_p4 = scmp.ge.s32.totalorder %s15_s11, 6   ;;  %s584_s10 = smov %s586_s13 }
 0x179   :  { %14 = sbr.rel (!%p12_p4) target bundleno = 3 (0x3), region = 69 }
 0x180   :  { %291 = vsyncpa [#allocation4], 1 }
 0x181   :  { %293 = vsyncpa [#allocation4 + $0x1], 1 }
 0x182   :  { %294 = vsyncpa [#allocation6], 1 }

// kernel: tv_image_loss.3
= control target key start
LH: loop header
LB: loop body
LE: loop exit
PB: predicated region body
PF: predicated region fallthrough
CT: control target
= control target key end

     0   :  { %s735_s0 = inlined_call_operand.<no memory space> [shape: f32[1,1], index: 0, kind: input, shape index: {}]   ;;  %s736_s1 = inlined_call_operand.<no memory space> [shape: f32[1,1], index: 1, kind: input, shape index: {}]   ;;  %s737_s2 = inlined_call_operand.vmem [shape: f32[64,128], index: 2, kind: input, shape index: {}]   ;;  %s738_s3 = inlined_call_operand.vmem [shape: f32[16,128], index: 3, kind: input, shape index: {}]   ;;  %s739_s4 = inlined_call_operand.hbm [shape: f32[1,1], index: 4, kind: output, shape index: {}]  }
   0x1   :  { %9 = sst [smem:[#allocation8]] %s735_s0 }
   0x2   :  { %10 = sst [smem:[#allocation9]] %s736_s1 }
   0x3   :  { %11 = vsyncpa [#allocation11], 0  ;;  %s646_s19 = smov 0   ;;  %s648_s20 = smov 0  }
   0x4   :  { %s650_s21 = smov 0  }
   0x5 LB: > { %s498_s0 = sadd.s32 4294967295, %s610_s21   ;;  %s26_s1 = sadd.s32 1, %s606_s20  ;;  %s610_s21 = sphi %s650_s21, %s17_s21   ;;  %s606_s20 = sphi %s648_s20, %s744_s20   ;;  %s602_s19 = sphi %s646_s19, %s743_s19  }
   0x6   : > { %p27_p0 = scmp.ge.s32.totalorder %s26_s1, 4  ;;  %p502_p1 = scmp.ge.s32.totalorder %s610_s21, 1 }
   0x7   : > { %p188_p2 = scmp.lt.s32.totalorder %s610_s21, 5 }
   0x8   : > { %s746_s1 = smov (%p27_p0, %s26_s1), 0 }
   0x9   : > { %p189_p3 = pnand %p502_p1, %p188_p2 }
   0xa   : > { %s503_s22 = sshll.u32 (!%p189_p3), %s602_s19, 1  ;;  %p230_p4 = scmp.eq.s32.totalorder (!%p189_p3), %s602_s19, 0 }
   0xb   : > { %192 = sbr.rel (%p189_p3) target bundleno = 417 (0x1a1), region = 36  ;;  %p217_p5 = scmp.lt.s32.totalorder (!%p189_p3), %s503_s22, 7 }
  0x12   : > { %s748_s22 = smov (!%p217_p5, %s503_s22), 7  ;;  %234 = sbr.rel (!%p230_p4) target bundleno = 25 (0x19), region = 40 }
  0x13   : > { %s504_s23 = sshll.u32 %s748_s22, 3  ;;  %vm235_vm0 = vcmask (%p230_p4), 0   ;;  %v612_v0 = vmov (%p230_p4), 0.0  }
  0x14   : > { %s220_s26 = scalar_lea.vmem %s737_s2, %s504_s23  ;;  %236 = vst.msk [vmem:[#allocation4] sm:$0x1] (%p230_p4), %vm235_vm0, %v612_v0  ;;  %237 = vst.msk [vmem:[#allocation5] sm:$0x1] (%p230_p4), %vm235_vm0, %v612_v0 }
  0x15   : > { %238 = vst.msk [vmem:[#allocation6] sm:$0x1] (%p230_p4), %vm235_vm0, %v612_v0  ;;  %239 = vst.msk [vmem:[#allocation7] sm:$0x1] (%p230_p4), %vm235_vm0, %v612_v0 }
  0x19 PF: > { %v240_v1 = vld [vmem:[%s220_s26] sm:$0xff]  ;;  %v241_v2 = vld [vmem:[%s220_s26 + $0x8] sm:$0xff]  ;;  %v246_v3 = vlaneseq  ;;  %s613_s27 = smov 127   ;;  %s244_s30 = sld [smem:[#allocation8]]  ;;  %vm292_vm5 = vcmask 0  }
  0x1a   : > { %352 = vrot.lane.b32.xlu0 %v240_v1, %s613_s27  ;;  %v255_v4 = vrot.slane %v240_v1, 1  ;;  %v256_v5 = vrot.slane %v241_v2, 1  ;;  %v243_v6 = vld [vmem:[%s738_s3 + $0x8] sm:$0xff]  ;;  %v242_v11 = vld [vmem:[%s738_s3] sm:$0xff]  ;;  %s245_s7 = sld [smem:[#allocation9]]  ;;  %p408_p6 = scmp.eq.s32.totalorder %s602_s19, 3 }
  0x1b   : > { %v247_v7 = vshrl.u32 %v246_v3, 7  ;;  %v250_v20 = vand.u32 127, %v246_v3  ;;  %v275_v62 = vld [vmem:[#allocation4] sm:$0x1] }
  0x1c   : > { %v294_v63 = vld [vmem:[#allocation6] sm:$0x1] }
  0x1d   : > { %v248_v8 = vadd.s32 8, %v247_v7  ;;  %vm257_vm1 = vcmp.lt.s32.totalorder %v247_v7, 7  ;;  %vm365_vm4 = vcmp.lt.s32.totalorder %v250_v20, 15 }
  0x1e   : > { %354 = vrot.lane.b32.xlu0 %v241_v2, %s613_s27  ;;  %v258_v9 = vsel %vm257_vm1, %v255_v4, %v256_v5  ;;  %v259_v10 = vsel %vm257_vm1, %v256_v5, %v255_v4  ;;  %v389_v28 = vsel %vm365_vm4, %v242_v11, 0.0  ;;  %v390_v29 = vsel %vm365_vm4, %v243_v6, 0.0 }
  0x1f   : > { %vm270_vm2 = vcmp.lt.s32.totalorder %v248_v8, 15  ;;  %v260_v12 = vsub.f32 %v240_v1, %v258_v9  ;;  %v261_v13 = vsub.f32 %v241_v2, %v259_v10  ;;  %v264_v18 = vstv %s244_s30 }
  0x20   : > { %vm678_vm3 = vmand %vm270_vm2, %vm270_vm2  ;;  %v391_v31 = vadd.f32 %v390_v29, %v389_v28  ;;  %v360_v34 = vstv %s245_s7 }
  0x21   : > { %v296_v15 = vsel %vm678_vm3, %v243_v6, 0.0  ;;  %v262_v16 = vmul.f32 %v260_v12, %v260_v12  ;;  %v263_v17 = vmul.f32 %v261_v13, %v261_v13 }
  0x22   : > { %v297_v19 = vadd.f32 %v296_v15, %v242_v11 }
  0x23   : > { %v265_v21 = vsub.f32 %v262_v16, %v264_v18  ;;  %v266_v22 = vsub.f32 %v263_v17, %v264_v18  ;;  %v370_v18 = vld [vmem:[#allocation5] sm:$0x1] }
  0x24   : > { %298 = vadd.xlane.f32.xlu1 %v297_v19  ;;  %v388_v19 = vld [vmem:[#allocation7] sm:$0x1] }
  0x25   : > { %v267_v23 = vmax.f32 %v265_v21, 0.0  ;;  %v268_v24 = vmax.f32 %v266_v22, 0.0 }
  0x27   : > { %v276_v25 = vmul.f32 %v267_v23, %v242_v11  ;;  %v277_v26 = vmul.f32 %v268_v24, %v243_v6 }
  0x29   : > { %v279_v27 = vsel %vm678_vm3, %v277_v26, 0.0 }
  0x2a   : > { %v280_v30 = vadd.f32 %v279_v27, %v276_v25 }
  0x2c   : > { %281 = vadd.xlane.f32.xlu1 %v280_v30 }
  0x30   : > { %392 = vadd.xlane.f32.xlu1 %v391_v31 }
  0x8c   : > { %v353_v32 = vpop.permute.xlu0 %352 }
  0x8d   : > { %v356_v33 = vsub.f32 %v240_v1, %v353_v32 }
  0x8f   : > { %v358_v35 = vmul.f32 %v356_v33, %v356_v33 }
  0x90   : > { %v355_v36 = vpop.permute.xlu0 %354 }
  0x91   : > { %v361_v37 = vsub.f32 %v358_v35, %v360_v34  ;;  %v357_v38 = vsub.f32 %v241_v2, %v355_v36 }
  0x93   : > { %v363_v39 = vmax.f32 %v361_v37, 0.0  ;;  %v359_v40 = vmul.f32 %v357_v38, %v357_v38 }
  0x95   : > { %v362_v41 = vsub.f32 %v359_v40, %v360_v34  ;;  %v371_v43 = vmul.f32 %v363_v39, %v242_v11 }
  0x97   : > { %v364_v42 = vmax.f32 %v362_v41, 0.0  ;;  %v373_v45 = vsel %vm365_vm4, %v371_v43, 0.0 }
  0x99   : > { %v372_v44 = vmul.f32 %v364_v42, %v243_v6 }
  0x9b   : > { %v374_v46 = vsel %vm365_vm4, %v372_v44, 0.0 }
  0x9c   : > { %v375_v47 = vadd.f32 %v374_v46, %v373_v45 }
  0x9e   : > { %376 = vadd.xlane.f32.xlu0 %v375_v47 }
  0xb1   : > { %v299_v48 = vpop.xlane.xlu1 %298 }
  0xb2   : > { %v300_v49 = vrot.slane %v299_v48, 4 }
  0xb4   : > { %v301_v50 = vadd.f32 %v300_v49, %v299_v48 }
  0xb6   : > { %v302_v51 = vrot.slane %v301_v50, 2 }
  0xb8   : > { %v303_v54 = vadd.f32 %v302_v51, %v301_v50 }
  0xb9   : > { %v282_v52 = vpop.xlane.xlu1 %281 }
  0xba   : > { %v283_v53 = vrot.slane %v282_v52, 4  ;;  %v304_v57 = vrot.slane %v303_v54, 1 }
  0xbc   : > { %v284_v55 = vadd.f32 %v283_v53, %v282_v52  ;;  %v305_v60 = vadd.f32 %v304_v57, %v303_v54 }
  0xbd   : > { %v393_v4 = vpop.xlane.xlu1 %392 }
  0xbe   : > { %v285_v56 = vrot.slane %v284_v55, 2  ;;  %v394_v5 = vrot.slane %v393_v4, 4 }
  0xc0   : > { %v286_v58 = vadd.f32 %v285_v56, %v284_v55  ;;  %v395_v6 = vadd.f32 %v394_v5, %v393_v4 }
  0xc2   : > { %v287_v59 = vrot.slane %v286_v58, 1  ;;  %v396_v7 = vrot.slane %v395_v6, 2 }
  0xc4   : > { %v288_v61 = vadd.f32 %v287_v59, %v286_v58  ;;  %v397_v11 = vadd.f32 %v396_v7, %v395_v6 }
  0xc6   : > { %513 = vpush %v288_v61  ;;  %v398_v14 = vrot.slane %v397_v11, 1 }
  0xc7   : > { %515 = vpush %v305_v60 }
  0xc8   : > { %v399_v17 = vadd.f32 %v398_v14, %v397_v11 }
  0xf7   : > { %s514_s8 = spop %513 }
  0xf8   : > { %v290_v0 = vstv %s514_s8  ;;  %s516_s9 = spop %515 }
  0xf9   : > { %v291_v1 = vadd.f32 %v290_v0, %v275_v62  ;;  %v307_v2 = vstv %s516_s9 }
  0xfa   : > { %v308_v3 = vadd.f32 %v307_v2, %v294_v63 }
  0xfb   : > { %293 = vst.msk [vmem:[#allocation4] sm:$0x1] %vm292_vm5, %v291_v1 }
  0xfc   : > { %309 = vst.msk [vmem:[#allocation6] sm:$0x1] %vm292_vm5, %v308_v3 }
 0x102   : > { %v413_v26 = vld [vmem:[#allocation4] sm:$0x1] (%p408_p6) }
 0x103   : > { %v414_v24 = vld [vmem:[#allocation6] sm:$0x1] (%p408_p6) }
 0x104   : > { %554 = vrcp.f32 (%p408_p6), %v414_v24 }
 0x10e   : > { %v555_v28 = vpop.eup (%p408_p6), %554 }
 0x10f   : > { %v416_v30 = vmul.f32 (%p408_p6), %v555_v28, %v413_v26 }
 0x12b   : > { %v377_v8 = vpop.xlane.xlu0 %376 }
 0x12c   : > { %v378_v9 = vrot.slane %v377_v8, 4 }
 0x12e   : > { %v379_v10 = vadd.f32 %v378_v9, %v377_v8 }
 0x130   : > { %v380_v12 = vrot.slane %v379_v10, 2 }
 0x132   : > { %v381_v13 = vadd.f32 %v380_v12, %v379_v10 }
 0x134   : > { %v382_v15 = vrot.slane %v381_v13, 1 }
 0x136   : > { %v383_v16 = vadd.f32 %v382_v15, %v381_v13 }
 0x138   : > { %517 = vpush %v383_v16 }
 0x139   : > { %519 = vpush %v399_v17 }
 0x168   : > { %412 = sbr.rel (!%p408_p6) target bundleno = 392 (0x188), region = 48 }
 0x169   : > { %s518_s10 = spop %517 }
 0x16a   : > { %v385_v20 = vstv %s518_s10  ;;  %s520_s11 = spop %519 }
 0x16b   : > { %v386_v21 = vadd.f32 %v385_v20, %v370_v18  ;;  %v401_v22 = vstv %s520_s11 }
 0x16c   : > { %v402_v23 = vadd.f32 %v401_v22, %v388_v19 }
 0x16d   : > { %387 = vst.msk [vmem:[#allocation5] sm:$0x1] %vm292_vm5, %v386_v21 }
 0x16e   : > { %403 = vst.msk [vmem:[#allocation7] sm:$0x1] %vm292_vm5, %v402_v23 }
 0x174   : > { %v417_v27 = vld [vmem:[#allocation5] sm:$0x1] }
 0x175   : > { %v418_v25 = vld [vmem:[#allocation7] sm:$0x1] }
 0x176   : > { %556 = vrcp.f32 %v418_v25 }
 0x180   : > { %v557_v29 = vpop.eup %556 }
 0x181   : > { %v420_v31 = vmul.f32 %v557_v29, %v417_v27 }
 0x183   : > { %v421_v32 = vadd.f32 %v420_v31, %v416_v30 }
 0x185   : > { %v422_v33 = vmul.f32 0.5, %v421_v32 }
 0x187   : > { %423 = vst.msk [vmem:[#allocation10] sm:$0x1] %vm292_vm5, %v422_v33 }
 0x188 PF: > { %p700_p7 = scmp.eq.s32.totalorder %s498_s0, 3  ;;  %s614_s13 = smov [#allocation10]  }
 0x189   : > { %s431_s14 = sshll.u32 %s614_s13, 4  ;;  %s432_s14 = int_to_ptr.vmem [resolvable:$true] %s431_s14 }
 0x18a   : > { %s558_s15 = scalar_lea.vmem %s432_s14, 16  ;;  %s564_s16 = scalar_lea.vmem %s432_s14, 32 }
 0x18b   : > { %p559_p8 = scmp.ne.s32.totalorder %s432_s14, %s558_s15  ;;  %p565_p11 = scmp.lt.s32.totalorder %s432_s14, %s432_s14 }
 0x18c   : > { %p566_p12 = scmp.lt.s32.totalorder %s564_s16, %s558_s15 }
 0x18d   : > { %p560_p9 = pnand %p559_p8, %p700_p7 }
 0x18e   : > { %p567_p13 = por %p566_p12, %p565_p11 }
 0x18f   : > { %p561_p10 = pneg %p560_p9 }
 0x191   : > { %p568_p0 = pnand %p567_p13, %p561_p10 }
 0x193   : > { %571 = shalt.err (!%p568_p0)
}
 0x194   : > { %s572_s19 = scalar_lea.hbm %s739_s4, 16 }
 0x195   : > { %p573_p1 = scmp.ne.s32.totalorder %s739_s4, %s572_s19  ;;  %p578_p4 = scmp.lt.u32.totalorder %s572_s19, %s739_s4 }
 0x197   : > { %p574_p2 = pnand %p573_p1, %p700_p7 }
 0x199   : > { %p575_p3 = pneg %p574_p2 }
 0x19b   : > { %p580_p5 = pnand %p578_p4, %p575_p3 }
 0x19d   : > { %583 = shalt.err (!%p580_p5)
}
 0x19e   : > { %522 = dma.vmem_to_hbm [thread:$0]  (%p700_p7), %s432_s14, 16, %s739_s4, [#allocation11]  }
 0x19f   : > { %597 = dma.done.wait (%p700_p7), [#allocation11], 16  }
 0x1a0   : > { %599 = vsyncadd (%p700_p7), [#allocation11], 4294967280 }
 0x1a1 PF: > { %s17_s21 = sadd.s32 1, %s610_s21   ;;  %s743_s19 = smov %s606_s20 }
 0x1a2   : > { %p14_p6 = scmp.ge.s32.totalorder %s17_s21, 6   ;;  %s744_s20 = smov %s746_s1 }
 0x1a4   :  { %16 = sbr.rel (!%p14_p6) target bundleno = 5 (0x5), region = 82 }
 0x1ab   :  { %444 = vsyncpa [#allocation11], 1 }
 0x1ac   :  { %446 = vsyncpa [#allocation11 + $0x1], 1 }

</bundles_post_ra>
